<compile_context>
chip_gen: v7x
topology: tpu7x:2x2x1
jax: 0.10.0
libtpu: 0.0.40
codegen_flags: <defaults>
</compile_context>

<pallas_src>
import math
import jax
import jax.numpy as jnp
from jax import lax
from jax.experimental import pallas as pl
from jax.experimental.pallas import tpu as pltpu

B, S, D = 2, 8, 32          # batch, seq, hidden
H = 4                       # num attention heads
HEAD = D // H               # attention head size
BS = B * S
EPS = 1e-12                 # layer_norm_eps


def bert_attention_kernel(x_ref, w_ref, v_ref, out_ref):
    x = x_ref[...]                                    # (BS, D) == (16, 32)
    w = w_ref[...]                                    # (D, 4D) == (32, 128)
    vecs = v_ref[...]                                 # (2, 128)

    # One full-width projection: lanes [0:32)=Q*scale, [32:64)=K, [64:96)=V,
    # [96:128)=x@Wo (unused).  Row-0 of the vec slab is column-aligned, so a
    # single (1,128) sublane-broadcast add applies bq/bk/bv (bo lands on the
    # unused lanes and is ignored).
    proj = jnp.dot(x, w, preferred_element_type=jnp.float32) + vecs[0:1, :]   # (16, 128)

    dn = (((1,), (1,)), ((), ())) 

    # Per-(batch, head) attention on tiny (8, 8) tiles; all slices are static.
    # TODO(synk): attention-probs / hidden dropout omitted (identity in eval mode).
    ctx_rows = []
    for b in range(B):
        r = slice(b * S, (b + 1) * S)                 # 8-aligned sublane slice
        head_ctx = []
        for h in range(H):
            q = proj[r, h * HEAD:(h + 1) * HEAD]              # (S, HEAD), scale pre-folded
            k = proj[r, D + h * HEAD: D + (h + 1) * HEAD]
            v = proj[r, 2 * D + h * HEAD: 2 * D + (h + 1) * HEAD]
            s = lax.dot_general(q, k, dn, preferred_element_type=jnp.float32)  # (S, S)
            m = jnp.max(s, axis=-1, keepdims=True)
            e = jnp.exp(s - m)
            p = e * pl.reciprocal(jnp.sum(e, axis=-1, keepdims=True), approx=True)
            head_ctx.append(jnp.dot(p, v, preferred_element_type=jnp.float32))  # (S, HEAD)
        ctx_rows.append(jnp.concatenate(head_ctx, axis=1))    # (S, D)  lane concat
    ctx = jnp.concatenate(ctx_rows, axis=0)                   # (BS, D) sublane concat

    # Head merge fused into ONE output projection: ctx @ Wo  (single MXU push).
    wo = w[:, 3 * D:4 * D]                                    # (D, D) static lane slice
    attn = jnp.dot(ctx, wo, preferred_element_type=jnp.float32)

    bo = vecs[0:1, 3 * D:4 * D]                               # (1, D)
    gamma = vecs[1:2, 0:D]
    beta = vecs[1:2, D:2 * D]

    # BertSelfOutput: dense bias + residual + LayerNorm (biased var, eps inside sqrt).
    y = attn + bo + x
    mu = jnp.mean(y, axis=-1, keepdims=True)
    var = jnp.mean((y - mu) ** 2, axis=-1, keepdims=True)
    yn = (y - mu) * lax.rsqrt(var + EPS)
    out_ref[...] = yn * gamma + beta


def pack_params(params):
    """One-time repack of torch-Linear-layout params into 2 lane-dense slabs."""
    (wq, bq, wk, bk, wv, bv, wo, bo, gamma, beta) = params
    scale = 1.0 / math.sqrt(HEAD)

    # Weight slab (D, 4D) = (32, 128): [Wq*scale | Wk | Wv | Wo], lane-dense.
    w_slab = jnp.concatenate([wq * scale, wk, wv, wo], axis=1).astype(jnp.float32)

    # Vector slab (2, 128): row0 column-aligned with w_slab; row1 = gamma|beta|0.
    row0 = jnp.concatenate([bq[0] * scale, bk[0], bv[0], bo[0]])
    row1 = jnp.concatenate([gamma[0], beta[0], jnp.zeros((2 * D,), jnp.float32)])
    v_slab = jnp.stack([row0, row1], axis=0).astype(jnp.float32)
    return (w_slab, v_slab)


def bert_attention(x, packed_params):
    w_slab, v_slab = packed_params
    # Single invocation (no grid): ~20 KiB resident in VMEM, 3 input DMAs + 1 output.
    out = pl.pallas_call(
        bert_attention_kernel,
        out_shape=jax.ShapeDtypeStruct((BS, D), jnp.float32),
        in_specs=[pl.BlockSpec(memory_space=pltpu.MemorySpace.VMEM)] * 3,
        out_specs=pl.BlockSpec(memory_space=pltpu.MemorySpace.VMEM),
    )(x.reshape(BS, D), w_slab, v_slab)
    return out.reshape(B, S, D)


def make_params(key):
    keys = jax.random.split(key, 8)
    std = 0.02
    wq = std * jax.random.normal(keys[0], (D, D), jnp.float32)
    bq = std * jax.random.normal(keys[1], (1, D), jnp.float32)
    wk = std * jax.random.normal(keys[2], (D, D), jnp.float32)
    bk = std * jax.random.normal(keys[3], (1, D), jnp.float32)
    wv = std * jax.random.normal(keys[4], (D, D), jnp.float32)
    bv = std * jax.random.normal(keys[5], (1, D), jnp.float32)
    wo = std * jax.random.normal(keys[6], (D, D), jnp.float32)
    bo = std * jax.random.normal(keys[7], (1, D), jnp.float32)
    gamma = jnp.ones((1, D), jnp.float32)
    beta = jnp.zeros((1, D), jnp.float32)
    return (wq, bq, wk, bk, wv, bv, wo, bo, gamma, beta)


def bert_attention_ref(x, params):
    # Pure-JAX reference mirroring the torch forward pass (eval mode).
    (wq, bq, wk, bk, wv, bv, wo, bo, gamma, beta) = params
    q = x @ wq + bq[0]
    k = x @ wk + bk[0]
    v = x @ wv + bv[0]

    def split_heads(t):  # (B,S,D) -> (B,H,S,HEAD)
        return t.reshape(B, S, H, HEAD).transpose(0, 2, 1, 3)

    qh, kh, vh = split_heads(q), split_heads(k), split_heads(v)
    scores = jnp.einsum("bhqd,bhkd->bhqk", qh, kh) / math.sqrt(HEAD)
    probs = jax.nn.softmax(scores, axis=-1)
    ctx = jnp.einsum("bhqk,bhkd->bhqd", probs, vh)
    ctx = ctx.transpose(0, 2, 1, 3).reshape(B, S, D)
    y = ctx @ wo + bo[0] + x
    mu = jnp.mean(y, axis=-1, keepdims=True)
    var = jnp.mean((y - mu) ** 2, axis=-1, keepdims=True)
    return (y - mu) / jnp.sqrt(var + EPS) * gamma[0] + beta[0]


if __name__ == "__main__":
    key = jax.random.PRNGKey(0)
    kx, kp = jax.random.split(key)
    x = jax.random.normal(kx, (B, S, D), jnp.float32)
    params = make_params(kp)
    kernel_params = pack_params(params)   # one-time weight repacking / scale folding

    out = jax.block_until_ready(bert_attention(x, kernel_params))

    ref = bert_attention_ref(x, params)
    assert out.shape == (B, S, D)
    assert jnp.allclose(out, ref, atol=1e-4, rtol=1e-4), "mismatch vs reference"
    print("KERNEL_OK")
</pallas_src>

<mosaic_0001>
module attributes {stable_mosaic.version = 11 : i64} {
  func.func @bert_attention_kernel(%arg0: memref<16x32xf32, #tpu.memory_space<vmem>>, %arg1: memref<32x128xf32, #tpu.memory_space<vmem>>, %arg2: memref<2x128xf32, #tpu.memory_space<vmem>>, %arg3: memref<16x32xf32, #tpu.memory_space<vmem>>) attributes {dimension_semantics = [], scalar_prefetch = 0 : i64, scratch_operands = 0 : i64, tpu.core_type = #tpu.core_type<tc>} {
    %c0 = arith.constant 0 : index
    %c0_0 = arith.constant 0 : index
    %0 = vector.load %arg0[%c0, %c0_0] : memref<16x32xf32, #tpu.memory_space<vmem>>, vector<16x32xf32>
    %c0_1 = arith.constant 0 : index
    %c0_2 = arith.constant 0 : index
    %1 = vector.load %arg1[%c0_1, %c0_2] : memref<32x128xf32, #tpu.memory_space<vmem>>, vector<32x128xf32>
    %c0_3 = arith.constant 0 : index
    %c0_4 = arith.constant 0 : index
    %2 = vector.load %arg2[%c0_3, %c0_4] : memref<2x128xf32, #tpu.memory_space<vmem>>, vector<2x128xf32>
    %cst = arith.constant dense<0.000000e+00> : vector<16x128xf32>
    %3 = tpu.matmul %0, %1, %cst {dimension_numbers = #tpu.dot_dimension_numbers<[1], [0], [0], [1], [0, 0, 1, 1], [], []>} : vector<16x32xf32>, vector<32x128xf32>, vector<16x128xf32> -> vector<16x128xf32>
    %4 = vector.extract_strided_slice %2 {offsets = [0, 0], sizes = [1, 128], strides = [1, 1]} : vector<2x128xf32> to vector<1x128xf32>
    %5 = vector.broadcast %4 : vector<1x128xf32> to vector<16x128xf32>
    %6 = arith.addf %3, %5 : vector<16x128xf32>
    %7 = vector.extract_strided_slice %6 {offsets = [0, 0], sizes = [8, 8], strides = [1, 1]} : vector<16x128xf32> to vector<8x8xf32>
    %8 = vector.extract_strided_slice %6 {offsets = [0, 32], sizes = [8, 8], strides = [1, 1]} : vector<16x128xf32> to vector<8x8xf32>
    %9 = vector.extract_strided_slice %6 {offsets = [0, 64], sizes = [8, 8], strides = [1, 1]} : vector<16x128xf32> to vector<8x8xf32>
    %cst_5 = arith.constant dense<0.000000e+00> : vector<8x8xf32>
    %10 = tpu.matmul %7, %8, %cst_5 {dimension_numbers = #tpu.dot_dimension_numbers<[1], [1], [0], [0], [0, 0, 1, 0], [], []>} : vector<8x8xf32>, vector<8x8xf32>, vector<8x8xf32> -> vector<8x8xf32>
    %cst_6 = arith.constant dense<0xFF800000> : vector<8xf32>
    %11 = vector.multi_reduction <maximumf>, %10, %cst_6 [1] : vector<8x8xf32> to vector<8xf32>
    %12 = vector.shape_cast %11 : vector<8xf32> to vector<8x1xf32>
    %13 = vector.broadcast %12 : vector<8x1xf32> to vector<8x8xf32>
    %14 = arith.subf %10, %13 : vector<8x8xf32>
    %15 = math.exp %14 : vector<8x8xf32>
    %cst_7 = arith.constant dense<0.000000e+00> : vector<8xf32>
    %16 = vector.multi_reduction <add>, %15, %cst_7 [1] : vector<8x8xf32> to vector<8xf32>
    %17 = vector.shape_cast %16 : vector<8xf32> to vector<8x1xf32>
    %18 = tpu.reciprocal %17 {approx = true} : vector<8x1xf32> -> vector<8x1xf32>
    %19 = vector.broadcast %18 : vector<8x1xf32> to vector<8x8xf32>
    %20 = arith.mulf %15, %19 : vector<8x8xf32>
    %cst_8 = arith.constant dense<0.000000e+00> : vector<8x8xf32>
    %21 = tpu.matmul %20, %9, %cst_8 {dimension_numbers = #tpu.dot_dimension_numbers<[1], [0], [0], [1], [0, 0, 1, 1], [], []>} : vector<8x8xf32>, vector<8x8xf32>, vector<8x8xf32> -> vector<8x8xf32>
    %22 = vector.extract_strided_slice %6 {offsets = [0, 8], sizes = [8, 8], strides = [1, 1]} : vector<16x128xf32> to vector<8x8xf32>
    %23 = vector.extract_strided_slice %6 {offsets = [0, 40], sizes = [8, 8], strides = [1, 1]} : vector<16x128xf32> to vector<8x8xf32>
    %24 = vector.extract_strided_slice %6 {offsets = [0, 72], sizes = [8, 8], strides = [1, 1]} : vector<16x128xf32> to vector<8x8xf32>
    %cst_9 = arith.constant dense<0.000000e+00> : vector<8x8xf32>
    %25 = tpu.matmul %22, %23, %cst_9 {dimension_numbers = #tpu.dot_dimension_numbers<[1], [1], [0], [0], [0, 0, 1, 0], [], []>} : vector<8x8xf32>, vector<8x8xf32>, vector<8x8xf32> -> vector<8x8xf32>
    %cst_10 = arith.constant dense<0xFF800000> : vector<8xf32>
    %26 = vector.multi_reduction <maximumf>, %25, %cst_10 [1] : vector<8x8xf32> to vector<8xf32>
    %27 = vector.shape_cast %26 : vector<8xf32> to vector<8x1xf32>
    %28 = vector.broadcast %27 : vector<8x1xf32> to vector<8x8xf32>
    %29 = arith.subf %25, %28 : vector<8x8xf32>
    %30 = math.exp %29 : vector<8x8xf32>
    %cst_11 = arith.constant dense<0.000000e+00> : vector<8xf32>
    %31 = vector.multi_reduction <add>, %30, %cst_11 [1] : vector<8x8xf32> to vector<8xf32>
    %32 = vector.shape_cast %31 : vector<8xf32> to vector<8x1xf32>
    %33 = tpu.reciprocal %32 {approx = true} : vector<8x1xf32> -> vector<8x1xf32>
    %34 = vector.broadcast %33 : vector<8x1xf32> to vector<8x8xf32>
    %35 = arith.mulf %30, %34 : vector<8x8xf32>
    %cst_12 = arith.constant dense<0.000000e+00> : vector<8x8xf32>
    %36 = tpu.matmul %35, %24, %cst_12 {dimension_numbers = #tpu.dot_dimension_numbers<[1], [0], [0], [1], [0, 0, 1, 1], [], []>} : vector<8x8xf32>, vector<8x8xf32>, vector<8x8xf32> -> vector<8x8xf32>
    %37 = vector.extract_strided_slice %6 {offsets = [0, 16], sizes = [8, 8], strides = [1, 1]} : vector<16x128xf32> to vector<8x8xf32>
    %38 = vector.extract_strided_slice %6 {offsets = [0, 48], sizes = [8, 8], strides = [1, 1]} : vector<16x128xf32> to vector<8x8xf32>
    %39 = vector.extract_strided_slice %6 {offsets = [0, 80], sizes = [8, 8], strides = [1, 1]} : vector<16x128xf32> to vector<8x8xf32>
    %cst_13 = arith.constant dense<0.000000e+00> : vector<8x8xf32>
    %40 = tpu.matmul %37, %38, %cst_13 {dimension_numbers = #tpu.dot_dimension_numbers<[1], [1], [0], [0], [0, 0, 1, 0], [], []>} : vector<8x8xf32>, vector<8x8xf32>, vector<8x8xf32> -> vector<8x8xf32>
    %cst_14 = arith.constant dense<0xFF800000> : vector<8xf32>
    %41 = vector.multi_reduction <maximumf>, %40, %cst_14 [1] : vector<8x8xf32> to vector<8xf32>
    %42 = vector.shape_cast %41 : vector<8xf32> to vector<8x1xf32>
    %43 = vector.broadcast %42 : vector<8x1xf32> to vector<8x8xf32>
    %44 = arith.subf %40, %43 : vector<8x8xf32>
    %45 = math.exp %44 : vector<8x8xf32>
    %cst_15 = arith.constant dense<0.000000e+00> : vector<8xf32>
    %46 = vector.multi_reduction <add>, %45, %cst_15 [1] : vector<8x8xf32> to vector<8xf32>
    %47 = vector.shape_cast %46 : vector<8xf32> to vector<8x1xf32>
    %48 = tpu.reciprocal %47 {approx = true} : vector<8x1xf32> -> vector<8x1xf32>
    %49 = vector.broadcast %48 : vector<8x1xf32> to vector<8x8xf32>
    %50 = arith.mulf %45, %49 : vector<8x8xf32>
    %cst_16 = arith.constant dense<0.000000e+00> : vector<8x8xf32>
    %51 = tpu.matmul %50, %39, %cst_16 {dimension_numbers = #tpu.dot_dimension_numbers<[1], [0], [0], [1], [0, 0, 1, 1], [], []>} : vector<8x8xf32>, vector<8x8xf32>, vector<8x8xf32> -> vector<8x8xf32>
    %52 = vector.extract_strided_slice %6 {offsets = [0, 24], sizes = [8, 8], strides = [1, 1]} : vector<16x128xf32> to vector<8x8xf32>
    %53 = vector.extract_strided_slice %6 {offsets = [0, 56], sizes = [8, 8], strides = [1, 1]} : vector<16x128xf32> to vector<8x8xf32>
    %54 = vector.extract_strided_slice %6 {offsets = [0, 88], sizes = [8, 8], strides = [1, 1]} : vector<16x128xf32> to vector<8x8xf32>
    %cst_17 = arith.constant dense<0.000000e+00> : vector<8x8xf32>
    %55 = tpu.matmul %52, %53, %cst_17 {dimension_numbers = #tpu.dot_dimension_numbers<[1], [1], [0], [0], [0, 0, 1, 0], [], []>} : vector<8x8xf32>, vector<8x8xf32>, vector<8x8xf32> -> vector<8x8xf32>
    %cst_18 = arith.constant dense<0xFF800000> : vector<8xf32>
    %56 = vector.multi_reduction <maximumf>, %55, %cst_18 [1] : vector<8x8xf32> to vector<8xf32>
    %57 = vector.shape_cast %56 : vector<8xf32> to vector<8x1xf32>
    %58 = vector.broadcast %57 : vector<8x1xf32> to vector<8x8xf32>
    %59 = arith.subf %55, %58 : vector<8x8xf32>
    %60 = math.exp %59 : vector<8x8xf32>
    %cst_19 = arith.constant dense<0.000000e+00> : vector<8xf32>
    %61 = vector.multi_reduction <add>, %60, %cst_19 [1] : vector<8x8xf32> to vector<8xf32>
    %62 = vector.shape_cast %61 : vector<8xf32> to vector<8x1xf32>
    %63 = tpu.reciprocal %62 {approx = true} : vector<8x1xf32> -> vector<8x1xf32>
    %64 = vector.broadcast %63 : vector<8x1xf32> to vector<8x8xf32>
    %65 = arith.mulf %60, %64 : vector<8x8xf32>
    %cst_20 = arith.constant dense<0.000000e+00> : vector<8x8xf32>
    %66 = tpu.matmul %65, %54, %cst_20 {dimension_numbers = #tpu.dot_dimension_numbers<[1], [0], [0], [1], [0, 0, 1, 1], [], []>} : vector<8x8xf32>, vector<8x8xf32>, vector<8x8xf32> -> vector<8x8xf32>
    %67 = tpu.concatenate %21, %36, %51, %66 in 1 : vector<8x8xf32>, vector<8x8xf32>, vector<8x8xf32>, vector<8x8xf32> -> vector<8x32xf32>
    %68 = vector.extract_strided_slice %6 {offsets = [8, 0], sizes = [8, 8], strides = [1, 1]} : vector<16x128xf32> to vector<8x8xf32>
    %69 = vector.extract_strided_slice %6 {offsets = [8, 32], sizes = [8, 8], strides = [1, 1]} : vector<16x128xf32> to vector<8x8xf32>
    %70 = vector.extract_strided_slice %6 {offsets = [8, 64], sizes = [8, 8], strides = [1, 1]} : vector<16x128xf32> to vector<8x8xf32>
    %cst_21 = arith.constant dense<0.000000e+00> : vector<8x8xf32>
    %71 = tpu.matmul %68, %69, %cst_21 {dimension_numbers = #tpu.dot_dimension_numbers<[1], [1], [0], [0], [0, 0, 1, 0], [], []>} : vector<8x8xf32>, vector<8x8xf32>, vector<8x8xf32> -> vector<8x8xf32>
    %cst_22 = arith.constant dense<0xFF800000> : vector<8xf32>
    %72 = vector.multi_reduction <maximumf>, %71, %cst_22 [1] : vector<8x8xf32> to vector<8xf32>
    %73 = vector.shape_cast %72 : vector<8xf32> to vector<8x1xf32>
    %74 = vector.broadcast %73 : vector<8x1xf32> to vector<8x8xf32>
    %75 = arith.subf %71, %74 : vector<8x8xf32>
    %76 = math.exp %75 : vector<8x8xf32>
    %cst_23 = arith.constant dense<0.000000e+00> : vector<8xf32>
    %77 = vector.multi_reduction <add>, %76, %cst_23 [1] : vector<8x8xf32> to vector<8xf32>
    %78 = vector.shape_cast %77 : vector<8xf32> to vector<8x1xf32>
    %79 = tpu.reciprocal %78 {approx = true} : vector<8x1xf32> -> vector<8x1xf32>
    %80 = vector.broadcast %79 : vector<8x1xf32> to vector<8x8xf32>
    %81 = arith.mulf %76, %80 : vector<8x8xf32>
    %cst_24 = arith.constant dense<0.000000e+00> : vector<8x8xf32>
    %82 = tpu.matmul %81, %70, %cst_24 {dimension_numbers = #tpu.dot_dimension_numbers<[1], [0], [0], [1], [0, 0, 1, 1], [], []>} : vector<8x8xf32>, vector<8x8xf32>, vector<8x8xf32> -> vector<8x8xf32>
    %83 = vector.extract_strided_slice %6 {offsets = [8, 8], sizes = [8, 8], strides = [1, 1]} : vector<16x128xf32> to vector<8x8xf32>
    %84 = vector.extract_strided_slice %6 {offsets = [8, 40], sizes = [8, 8], strides = [1, 1]} : vector<16x128xf32> to vector<8x8xf32>
    %85 = vector.extract_strided_slice %6 {offsets = [8, 72], sizes = [8, 8], strides = [1, 1]} : vector<16x128xf32> to vector<8x8xf32>
    %cst_25 = arith.constant dense<0.000000e+00> : vector<8x8xf32>
    %86 = tpu.matmul %83, %84, %cst_25 {dimension_numbers = #tpu.dot_dimension_numbers<[1], [1], [0], [0], [0, 0, 1, 0], [], []>} : vector<8x8xf32>, vector<8x8xf32>, vector<8x8xf32> -> vector<8x8xf32>
    %cst_26 = arith.constant dense<0xFF800000> : vector<8xf32>
    %87 = vector.multi_reduction <maximumf>, %86, %cst_26 [1] : vector<8x8xf32> to vector<8xf32>
    %88 = vector.shape_cast %87 : vector<8xf32> to vector<8x1xf32>
    %89 = vector.broadcast %88 : vector<8x1xf32> to vector<8x8xf32>
    %90 = arith.subf %86, %89 : vector<8x8xf32>
    %91 = math.exp %90 : vector<8x8xf32>
    %cst_27 = arith.constant dense<0.000000e+00> : vector<8xf32>
    %92 = vector.multi_reduction <add>, %91, %cst_27 [1] : vector<8x8xf32> to vector<8xf32>
    %93 = vector.shape_cast %92 : vector<8xf32> to vector<8x1xf32>
    %94 = tpu.reciprocal %93 {approx = true} : vector<8x1xf32> -> vector<8x1xf32>
    %95 = vector.broadcast %94 : vector<8x1xf32> to vector<8x8xf32>
    %96 = arith.mulf %91, %95 : vector<8x8xf32>
    %cst_28 = arith.constant dense<0.000000e+00> : vector<8x8xf32>
    %97 = tpu.matmul %96, %85, %cst_28 {dimension_numbers = #tpu.dot_dimension_numbers<[1], [0], [0], [1], [0, 0, 1, 1], [], []>} : vector<8x8xf32>, vector<8x8xf32>, vector<8x8xf32> -> vector<8x8xf32>
    %98 = vector.extract_strided_slice %6 {offsets = [8, 16], sizes = [8, 8], strides = [1, 1]} : vector<16x128xf32> to vector<8x8xf32>
    %99 = vector.extract_strided_slice %6 {offsets = [8, 48], sizes = [8, 8], strides = [1, 1]} : vector<16x128xf32> to vector<8x8xf32>
    %100 = vector.extract_strided_slice %6 {offsets = [8, 80], sizes = [8, 8], strides = [1, 1]} : vector<16x128xf32> to vector<8x8xf32>
    %cst_29 = arith.constant dense<0.000000e+00> : vector<8x8xf32>
    %101 = tpu.matmul %98, %99, %cst_29 {dimension_numbers = #tpu.dot_dimension_numbers<[1], [1], [0], [0], [0, 0, 1, 0], [], []>} : vector<8x8xf32>, vector<8x8xf32>, vector<8x8xf32> -> vector<8x8xf32>
    %cst_30 = arith.constant dense<0xFF800000> : vector<8xf32>
    %102 = vector.multi_reduction <maximumf>, %101, %cst_30 [1] : vector<8x8xf32> to vector<8xf32>
    %103 = vector.shape_cast %102 : vector<8xf32> to vector<8x1xf32>
    %104 = vector.broadcast %103 : vector<8x1xf32> to vector<8x8xf32>
    %105 = arith.subf %101, %104 : vector<8x8xf32>
    %106 = math.exp %105 : vector<8x8xf32>
    %cst_31 = arith.constant dense<0.000000e+00> : vector<8xf32>
    %107 = vector.multi_reduction <add>, %106, %cst_31 [1] : vector<8x8xf32> to vector<8xf32>
    %108 = vector.shape_cast %107 : vector<8xf32> to vector<8x1xf32>
    %109 = tpu.reciprocal %108 {approx = true} : vector<8x1xf32> -> vector<8x1xf32>
    %110 = vector.broadcast %109 : vector<8x1xf32> to vector<8x8xf32>
    %111 = arith.mulf %106, %110 : vector<8x8xf32>
    %cst_32 = arith.constant dense<0.000000e+00> : vector<8x8xf32>
    %112 = tpu.matmul %111, %100, %cst_32 {dimension_numbers = #tpu.dot_dimension_numbers<[1], [0], [0], [1], [0, 0, 1, 1], [], []>} : vector<8x8xf32>, vector<8x8xf32>, vector<8x8xf32> -> vector<8x8xf32>
    %113 = vector.extract_strided_slice %6 {offsets = [8, 24], sizes = [8, 8], strides = [1, 1]} : vector<16x128xf32> to vector<8x8xf32>
    %114 = vector.extract_strided_slice %6 {offsets = [8, 56], sizes = [8, 8], strides = [1, 1]} : vector<16x128xf32> to vector<8x8xf32>
    %115 = vector.extract_strided_slice %6 {offsets = [8, 88], sizes = [8, 8], strides = [1, 1]} : vector<16x128xf32> to vector<8x8xf32>
    %cst_33 = arith.constant dense<0.000000e+00> : vector<8x8xf32>
    %116 = tpu.matmul %113, %114, %cst_33 {dimension_numbers = #tpu.dot_dimension_numbers<[1], [1], [0], [0], [0, 0, 1, 0], [], []>} : vector<8x8xf32>, vector<8x8xf32>, vector<8x8xf32> -> vector<8x8xf32>
    %cst_34 = arith.constant dense<0xFF800000> : vector<8xf32>
    %117 = vector.multi_reduction <maximumf>, %116, %cst_34 [1] : vector<8x8xf32> to vector<8xf32>
    %118 = vector.shape_cast %117 : vector<8xf32> to vector<8x1xf32>
    %119 = vector.broadcast %118 : vector<8x1xf32> to vector<8x8xf32>
    %120 = arith.subf %116, %119 : vector<8x8xf32>
    %121 = math.exp %120 : vector<8x8xf32>
    %cst_35 = arith.constant dense<0.000000e+00> : vector<8xf32>
    %122 = vector.multi_reduction <add>, %121, %cst_35 [1] : vector<8x8xf32> to vector<8xf32>
    %123 = vector.shape_cast %122 : vector<8xf32> to vector<8x1xf32>
    %124 = tpu.reciprocal %123 {approx = true} : vector<8x1xf32> -> vector<8x1xf32>
    %125 = vector.broadcast %124 : vector<8x1xf32> to vector<8x8xf32>
    %126 = arith.mulf %121, %125 : vector<8x8xf32>
    %cst_36 = arith.constant dense<0.000000e+00> : vector<8x8xf32>
    %127 = tpu.matmul %126, %115, %cst_36 {dimension_numbers = #tpu.dot_dimension_numbers<[1], [0], [0], [1], [0, 0, 1, 1], [], []>} : vector<8x8xf32>, vector<8x8xf32>, vector<8x8xf32> -> vector<8x8xf32>
    %128 = tpu.concatenate %82, %97, %112, %127 in 1 : vector<8x8xf32>, vector<8x8xf32>, vector<8x8xf32>, vector<8x8xf32> -> vector<8x32xf32>
    %129 = tpu.concatenate %67, %128 in 0 : vector<8x32xf32>, vector<8x32xf32> -> vector<16x32xf32>
    %130 = vector.extract_strided_slice %1 {offsets = [0, 96], sizes = [32, 32], strides = [1, 1]} : vector<32x128xf32> to vector<32x32xf32>
    %cst_37 = arith.constant dense<0.000000e+00> : vector<16x32xf32>
    %131 = tpu.matmul %129, %130, %cst_37 {dimension_numbers = #tpu.dot_dimension_numbers<[1], [0], [0], [1], [0, 0, 1, 1], [], []>} : vector<16x32xf32>, vector<32x32xf32>, vector<16x32xf32> -> vector<16x32xf32>
    %132 = vector.extract_strided_slice %2 {offsets = [0, 96], sizes = [1, 32], strides = [1, 1]} : vector<2x128xf32> to vector<1x32xf32>
    %133 = vector.extract_strided_slice %2 {offsets = [1, 0], sizes = [1, 32], strides = [1, 1]} : vector<2x128xf32> to vector<1x32xf32>
    %134 = vector.extract_strided_slice %2 {offsets = [1, 32], sizes = [1, 32], strides = [1, 1]} : vector<2x128xf32> to vector<1x32xf32>
    %135 = vector.broadcast %132 : vector<1x32xf32> to vector<16x32xf32>
    %136 = arith.addf %131, %135 : vector<16x32xf32>
    %137 = arith.addf %136, %0 : vector<16x32xf32>
    %cst_38 = arith.constant dense<0.000000e+00> : vector<16xf32>
    %138 = vector.multi_reduction <add>, %137, %cst_38 [1] : vector<16x32xf32> to vector<16xf32>
    %139 = vector.shape_cast %138 : vector<16xf32> to vector<16x1xf32>
    %cst_39 = arith.constant 3.200000e+01 : f32
    %140 = vector.broadcast %cst_39 : f32 to vector<16x1xf32>
    %141 = arith.divf %139, %140 : vector<16x1xf32>
    %142 = vector.broadcast %141 : vector<16x1xf32> to vector<16x32xf32>
    %143 = arith.subf %137, %142 : vector<16x32xf32>
    %144 = arith.mulf %143, %143 : vector<16x32xf32>
    %cst_40 = arith.constant dense<0.000000e+00> : vector<16xf32>
    %145 = vector.multi_reduction <add>, %144, %cst_40 [1] : vector<16x32xf32> to vector<16xf32>
    %146 = vector.shape_cast %145 : vector<16xf32> to vector<16x1xf32>
    %cst_41 = arith.constant 3.200000e+01 : f32
    %147 = vector.broadcast %cst_41 : f32 to vector<16x1xf32>
    %148 = arith.divf %146, %147 : vector<16x1xf32>
    %149 = vector.broadcast %141 : vector<16x1xf32> to vector<16x32xf32>
    %150 = arith.subf %137, %149 : vector<16x32xf32>
    %cst_42 = arith.constant 9.99999996E-13 : f32
    %151 = vector.broadcast %cst_42 : f32 to vector<16x1xf32>
    %152 = arith.addf %148, %151 : vector<16x1xf32>
    %153 = math.rsqrt %152 : vector<16x1xf32>
    %154 = vector.broadcast %153 : vector<16x1xf32> to vector<16x32xf32>
    %155 = arith.mulf %150, %154 : vector<16x32xf32>
    %156 = vector.broadcast %133 : vector<1x32xf32> to vector<16x32xf32>
    %157 = arith.mulf %155, %156 : vector<16x32xf32>
    %158 = vector.broadcast %134 : vector<1x32xf32> to vector<16x32xf32>
    %159 = arith.addf %157, %158 : vector<16x32xf32>
    %c0_43 = arith.constant 0 : index
    %c0_44 = arith.constant 0 : index
    %160 = vector.load %arg3[%c0_43, %c0_44] : memref<16x32xf32, #tpu.memory_space<vmem>>, vector<16x32xf32>
    tpu.vector_store %arg3[%c0_43, %c0_44], %159 {strides = array<i32>} : memref<16x32xf32, #tpu.memory_space<vmem>>, vector<16x32xf32>,
    return
  }
}

</mosaic_0001>

<bundles_post_ra>
// kernel: tpu_custom_call.1
= control target key start
LH: loop header
LB: loop body
LE: loop exit
PB: predicated region body
PF: predicated region fallthrough
CT: control target
= control target key end

     0   :  { %8 = vsyncpa [#allocation3], 0  ;;  %s2282_s0 = inlined_call_operand.hbm [shape: f32[16,32], index: 0, kind: input, shape index: {}]   ;;  %s2283_s1 = inlined_call_operand.hbm [shape: f32[32,128], index: 1, kind: input, shape index: {}]   ;;  %s2284_s2 = inlined_call_operand.vmem [shape: f32[2,128], index: 2, kind: input, shape index: {}]   ;;  %s2285_s3 = inlined_call_operand.hbm [shape: f32[16,32], index: 3, kind: output, shape index: {}]  }
   0x1   :  { %9 = vsyncpa [#allocation6], 0 }
   0x2   :  { %10 = vsyncpa [#allocation4], 0  ;;  %s1978_s12 = smov [#allocation2]   ;;  %s1906_s16 = scalar_lea.hbm %s2282_s0, 256 }
   0x3   :  { %s16_s13 = sshll.u32 %s1978_s12, 4  ;;  %p1907_p0 = scmp.ne.s32.totalorder %s2282_s0, %s1906_s16  ;;  %s17_s13 = int_to_ptr.vmem [resolvable:$true] %s16_s13 }
   0x4   :  { %p1910_p1 = scmp.lt.u32.totalorder %s1906_s16, %s2282_s0 }
   0x6   :  { %p1912_p2 = pnand %p1910_p1, %p1907_p0 }
   0x8   :  { %1915 = shalt.err (!%p1912_p2)
}
   0x9   :  { %s1916_s21 = scalar_lea.vmem %s17_s13, 256  ;;  %p1921_p4 = scmp.lt.s32.totalorder %s17_s13, %s17_s13 }
   0xa   :  { %p1917_p3 = scmp.ne.s32.totalorder %s17_s13, %s1916_s21  ;;  %p1922_p5 = scmp.lt.s32.totalorder %s1916_s21, %s1916_s21 }
   0xc   :  { %p1923_p6 = por %p1922_p5, %p1921_p4 }
   0xe   :  { %p1924_p7 = pnand %p1923_p6, %p1917_p3 }
  0x10   :  { %1927 = shalt.err (!%p1924_p7)
}
  0x11   :  { %s1979_s22 = smov 128   ;;  %s1980_s23 = smov 8  }
  0x12   :  { %22 = dma.hbm_to_vmem [thread:$0]  %s2282_s0, 256, %s17_s13, [#allocation3], %s1979_s22, %s1979_s22, %s1980_s23  }
  0x13   :  { %s1981_s26 = smov [#allocation5]   ;;  %s1928_s30 = scalar_lea.hbm %s2283_s1, 512 }
  0x14   :  { %s28_s27 = sshll.u32 %s1981_s26, 4  ;;  %p1929_p8 = scmp.ne.s32.totalorder %s2283_s1, %s1928_s30  ;;  %s29_s27 = int_to_ptr.vmem [resolvable:$true] %s28_s27 }
  0x15   :  { %p1932_p9 = scmp.lt.u32.totalorder %s1928_s30, %s2283_s1 }
  0x17   :  { %p1934_p10 = pnand %p1932_p9, %p1929_p8 }
  0x19   :  { %1937 = shalt.err (!%p1934_p10)
}
  0x1a   :  { %s1938_s8 = scalar_lea.vmem %s29_s27, 512  ;;  %p1943_p12 = scmp.lt.s32.totalorder %s29_s27, %s29_s27 }
  0x1b   :  { %p1939_p11 = scmp.ne.s32.totalorder %s29_s27, %s1938_s8  ;;  %p1944_p13 = scmp.lt.s32.totalorder %s1938_s8, %s1938_s8 }
  0x1d   :  { %p1945_p0 = por %p1944_p13, %p1943_p12 }
  0x1f   :  { %p1946_p1 = pnand %p1945_p0, %p1939_p11 }
  0x21   :  { %1949 = shalt.err (!%p1946_p1)
}
  0x22   :  { %34 = dma.hbm_to_vmem [thread:$0]  %s2283_s1, 512, %s29_s27, [#allocation6], %s1979_s22, %s1979_s22, %s1980_s23  }
  0x23   :  { %1972 = dma.done.wait [#allocation3], 256  }
  0x24   :  { %1973 = vsyncadd [#allocation3], 4294967040 }
  0x25   :  { %1974 = dma.done.wait [#allocation6], 512  }
  0x26   :  { %1975 = vsyncadd [#allocation6], 4294966784  ;;  %vm54_vm0 = vcmask 261120   ;;  %v2049_v0 = vld [vmem:[#allocation5] sm:$0xff]  ;;  %v2051_v1 = vld [vmem:[#allocation5 + $0x8] sm:$0xff]  ;;  %v1982_v9 = vmov 0.0   ;;  %v50_v10 = vlaneseq }
  0x27   :  { %v2053_v2 = vld [vmem:[#allocation5 + $0x10] sm:$0xff]  ;;  %v1860_v3 = vpack.i.bf16 %v2051_v1, %v2049_v0  ;;  %v1823_v4 = vpack.c.bf16 %v2051_v1, %v2049_v0  ;;  %v2059_v5 = vld [vmem:[#allocation5 + $0x18] sm:$0xff]  ;;  %1732 = vmatprep.subr.mxu1 %v1982_v9  ;;  %vm1983_vm1 = vmmov 0   ;;  %s1984_s11 = smov 64   ;;  %s1985_s12 = smov 96   ;;  %vm139_vm2 = vcmask 64512  }
  0x28   :  { %v2061_v6 = vld [vmem:[#allocation2] sm:$0xff]  ;;  %v1827_v7 = vpack.c.bf16 %v2059_v5, %v2053_v2  ;;  %v2067_v8 = vld [vmem:[#allocation2 + $0x8] sm:$0xff]  ;;  %v2073_v11 = vshrl.u32 %v50_v10, 7  ;;  %1734 = vmatprep.mubr.msk.f32.mxu1 %vm1983_vm1, %v1982_v9  ;;  %s1986_s13 = smov 88   ;;  %s1988_s14 = smov 80   ;;  %vm809_vm3 = vcmask 130048  }
  0x29   :  { %1729 = vmatprep.mubr.msk.f32.mxu0 %vm54_vm0, %v2061_v6  ;;  %1824 = vmatprep.subr.bf16.mxu0 %v1823_v4  ;;  %v2083_v13 = vld [vmem:[%s2284_s2] sm:$0x3]  ;;  %s1987_s2 = smov 120   ;;  %s1989_s15 = smov 112   ;;  %vm811_vm4 = vcmask 195584  }
  0x2a   :  { %1826 = vmatpush3.bf16.msra.mxu0 %v1823_v4  ;;  %v52_v12 = vsub.s32 0, %v2073_v11  ;;  %s1990_s16 = smov 104   ;;  %s1991_s17 = smov 72  }
  0x2b   :  { %1828 = vmatprep.subr.bf16.mxu0 %v1827_v7  ;;  %s1992_s18 = smov 48   ;;  %s1993_s19 = smov 56  }
  0x2c   :  { %v2086_v14 = vrot.slane %v2083_v13, %v52_v12  ;;  %s1994_s20 = smov 40   ;;  %s1995_s21 = smov 32  }
  0x2d   :  { %s1996_s24 = smov 16   ;;  %s1997_s25 = smov 24  }
  0x2e   :  { %1830 = vmatpush3.bf16.msra.mxu0 %v1827_v7  ;;  %s1998_s26 = smov [#allocation7]  }
  0x2f   :  { %1752 = vmatprep.subr.mxu0 %v1982_v9  ;;  %s1636_s27 = sshll.u32 %s1998_s26, 4  ;;  %s1637_s27 = int_to_ptr.vmem [resolvable:$true] %s1636_s27 }
  0x30   :  { %s1950_s28 = scalar_lea.vmem %s1637_s27, 256  ;;  %p1955_p3 = scmp.lt.s32.totalorder %s1637_s27, %s1637_s27 }
  0x31   :  { %1730 = vmatmul.mubr.msk.f32.vlgmr.msra.gmra.mrb[0].mxu0 %vm54_vm0, %v2067_v8  ;;  %p1951_p2 = scmp.ne.s32.totalorder %s1637_s27, %s1950_s28  ;;  %p1956_p4 = scmp.lt.s32.totalorder %s1950_s28, %s1950_s28 }
  0x32   :  { %1754 = vmatprep.mubr.msk.f32.mxu0 %vm1983_vm1, %v1982_v9 }
  0x33   :  { %p1957_p5 = por %p1956_p4, %p1955_p3 }
  0x35   :  { %p1958_p6 = pnand %p1957_p5, %p1951_p2 }
 0x104   :  { %v1731_v15 = vpop.f32.mrb[0].mxu0 }
 0x105   :  { %v127_v16 = vpop.f32.mrb[1].mxu0  ;;  %v2120_v29 = vadd.f32 %v1731_v15, %v2086_v14 }
 0x106   :  { %v2089_v17 = vadd.f32 %v127_v16, %v2086_v14 }
 0x108   :  { %225 = vrot.lane.b32.xlu1 %v2089_v17, %s1984_s11  ;;  %137 = vrot.lane.b32.xlu0 %v2089_v17, %s1985_s12 }
 0x10c   :  { %303 = vrot.lane.b32.xlu1 %v2089_v17, %s1986_s13 }
 0x110   :  { %301 = vrot.lane.b32.xlu1 %v2089_v17, %s1987_s2 }
 0x114   :  { %468 = vrot.lane.b32.xlu1 %v2089_v17, %s1988_s14 }
 0x118   :  { %466 = vrot.lane.b32.xlu1 %v2089_v17, %s1989_s15 }
 0x11c   :  { %631 = vrot.lane.b32.xlu1 %v2089_v17, %s1990_s16 }
 0x17a   :  { %v226_v18 = vpop.permute.xlu1 %225  ;;  %v138_v19 = vpop.permute.xlu0 %137 }
 0x17b   :  { %1733 = vmatpush3.xpose.msk.msra.mxu1 %vm139_vm2, %v138_v19 }
 0x17c   :  { %1737 = vmatprep.subr.mxu1 %v1982_v9 }
 0x17e   :  { %v304_v20 = vpop.permute.xlu1 %303  ;;  %1735 = vmatmul.mubr.msk.f32.vlgmr.msra.gmra.mrb[0].mxu1 %vm139_vm2, %v2089_v17 }
 0x17f   :  { %1738 = vmatpush3.msra.mxu1 %v226_v18  ;;  %1739 = vmatprep.mubr.msk.f32.mxu1 %vm1983_vm1, %v1982_v9 }
 0x180   :  { %1742 = vmatprep.subr.mxu1 %v1982_v9 }
 0x182   :  { %v302_v21 = vpop.permute.xlu1 %301 }
 0x186   :  { %v469_v22 = vpop.permute.xlu1 %468 }
 0x187   :  { %1753 = vmatpush3.xpose.msk.msra.mxu0 %vm139_vm2, %v469_v22 }
 0x188   :  { %1762 = vmatprep.subr.mxu0 %v1982_v9 }
 0x18a   :  { %v467_v23 = vpop.permute.xlu1 %466 }
 0x18b   :  { %1755 = vmatmul.mubr.msk.f32.vlgmr.msra.gmra.mrb[2].mxu0 %vm139_vm2, %v467_v23 }
 0x18c   :  { %1764 = vmatprep.mubr.msk.f32.mxu0 %vm1983_vm1, %v1982_v9 }
 0x18e   :  { %v632_v35 = vpop.permute.xlu1 %631 }
 0x251   :  { %v210_v24 = vpop.f32.mrb[0].mxu1 }
 0x252   :  { %v1736_v25 = vpop.f32.mrb[1].mxu1  ;;  %v214_v26 = vsel %vm139_vm2, %v210_v24, -inf }
 0x253   :  { %215 = vmax.xlane.f32.xlu0 %v214_v26 }
 0x25e   :  { %v2116_v27 = vpop.f32.mrb[2].mxu0 }
 0x25f   :  { %v1756_v28 = vpop.f32.mrb[3].mxu0  ;;  %v544_v30 = vsel %vm139_vm2, %v2116_v27, -inf }
 0x269   :  { %633 = vrot.lane.b32.xlu0 %v2089_v17, %s1991_s17 }
 0x26d   :  { %1142 = vrot.lane.b32.xlu0 %v2120_v29, %s1989_s15 }
 0x271   :  { %1307 = vrot.lane.b32.xlu0 %v2120_v29, %s1990_s16 }
 0x290   :  { %545 = vmax.xlane.f32.xlu0 %v544_v30 }
 0x2e0   :  { %v216_v31 = vpop.xlane.xlu0 %215 }
 0x2e1   :  { %v217_v32 = vsub.f32 %v210_v24, %v216_v31 }
 0x2e3   :  { %v218_v33 = vmul.f32 1.442695, %v217_v32 }
 0x2e4   :  { %v634_v34 = vpop.permute.xlu0 %633 }
 0x2e5   :  { %1870 = vpow2.f32 %v218_v33  ;;  %1763 = vmatpush3.xpose.msk.msra.mxu0 %vm139_vm2, %v634_v34 }
 0x2e6   :  { %1772 = vmatprep.subr.mxu0 %v1982_v9 }
 0x2e8   :  { %1765 = vmatmul.mubr.msk.f32.vlgmr.msra.gmra.mrb[4].mxu0 %vm139_vm2, %v632_v35  ;;  %v1143_v45 = vpop.permute.xlu0 %1142 }
 0x2e9   :  { %1774 = vmatprep.mubr.msk.f32.mxu0 %vm1983_vm1, %v1982_v9 }
 0x2ec   :  { %v1308_v47 = vpop.permute.xlu0 %1307 }
 0x2ef   :  { %v1871_v36 = vpop.eup %1870 }
 0x2f0   :  { %v220_v37 = vsel %vm139_vm2, %v1871_v36, 0.0 }
 0x2f1   :  { %221 = vadd.xlane.f32.xlu1 %v220_v37 }
 0x302   :  { %814 = vrot.lane.b32.xlu1 %v2120_v29, %s1985_s12 }
 0x306   :  { %979 = vrot.lane.b32.xlu1 %v2120_v29, %s1986_s13 }
 0x30a   :  { %977 = vrot.lane.b32.xlu1 %v2120_v29, %s1987_s2 }
 0x30e   :  { %1144 = vrot.lane.b32.xlu1 %v2120_v29, %s1988_s14 }
 0x312   :  { %1309 = vrot.lane.b32.xlu1 %v2120_v29, %s1991_s17 }
 0x31d   :  { %v546_v51 = vpop.xlane.xlu0 %545 }
 0x31e   :  { %v547_v53 = vsub.f32 %v2116_v27, %v546_v51 }
 0x320   :  { %v548_v57 = vmul.f32 1.442695, %v547_v53 }
 0x37e   :  { %v222_v38 = vpop.xlane.xlu1 %221 }
 0x37f   :  { %1872 = vrcp.f32 %v222_v38 }
 0x380   :  { %1874 = vpow2.f32 %v548_v57 }
 0x382   :  { %v815_v39 = vpop.permute.xlu1 %814 }
 0x383   :  { %1773 = vmatpush3.xpose.msk.msra.mxu0 %vm139_vm2, %v815_v39 }
 0x384   :  { %1782 = vmatprep.subr.mxu0 %v1982_v9 }
 0x386   :  { %v980_v40 = vpop.permute.xlu1 %979  ;;  %1775 = vmatmul.mubr.msk.f32.vlgmr.msra.gmra.mrb[6].mxu0 %vm139_vm2, %v2120_v29 }
 0x387   :  { %1783 = vmatpush3.xpose.msk.msra.mxu0 %vm139_vm2, %v980_v40  ;;  %1784 = vmatprep.mubr.msk.f32.mxu0 %vm1983_vm1, %v1982_v9 }
 0x388   :  { %1792 = vmatprep.subr.mxu0 %v1982_v9 }
 0x389   :  { %v1873_v41 = vpop.eup %1872 }
 0x38a   :  { %v224_v42 = vmul.f32 %v1873_v41, %v1871_v36  ;;  %v978_v43 = vpop.permute.xlu1 %977 }
 0x38b   :  { %1785 = vmatmul.mubr.msk.f32.vlgmr.msra.gmra.mrb[8].mxu0 %vm139_vm2, %v978_v43 }
 0x38c   :  { %1740 = vmatmul.mubr.msk.f32.vlgmr.msra.gmra.mrb[2].mxu1 %vm139_vm2, %v224_v42  ;;  %1794 = vmatprep.mubr.msk.f32.mxu0 %vm1983_vm1, %v1982_v9 }
 0x38d   :  { %1743 = vmatpush3.xpose.msk.msra.mxu1 %vm139_vm2, %v304_v20  ;;  %1744 = vmatprep.mubr.msk.f32.mxu1 %vm1983_vm1, %v1982_v9 }
 0x38e   :  { %v1145_v44 = vpop.permute.xlu1 %1144  ;;  %1747 = vmatprep.subr.mxu1 %v1982_v9 }
 0x38f   :  { %1793 = vmatpush3.xpose.msk.msra.mxu0 %vm139_vm2, %v1145_v44 }
 0x390   :  { %1745 = vmatmul.mubr.msk.f32.vlgmr.msra.gmra.mrb[4].mxu1 %vm139_vm2, %v302_v21  ;;  %1802 = vmatprep.subr.mxu0 %v1982_v9  ;;  %v2175_v21 = vpop.eup %1874 }
 0x391   :  { %1749 = vmatprep.mubr.msk.f32.mxu1 %vm1983_vm1, %v1982_v9  ;;  %v550_v24 = vsel %vm139_vm2, %v2175_v21, 0.0 }
 0x392   :  { %v1310_v46 = vpop.permute.xlu1 %1309  ;;  %1795 = vmatmul.mubr.msk.f32.vlgmr.msra.gmra.mrb[10].mxu0 %vm139_vm2, %v1143_v45 }
 0x393   :  { %1803 = vmatpush3.xpose.msk.msra.mxu0 %vm139_vm2, %v1310_v46  ;;  %1804 = vmatprep.mubr.msk.f32.mxu0 %vm1983_vm1, %v1982_v9 }
 0x396   :  { %1805 = vmatmul.mubr.msk.f32.vlgmr.msra.gmra.mrb[12].mxu0 %vm139_vm2, %v1308_v47 }
 0x3bb   :  { %v705_v48 = vpop.f32.mrb[4].mxu0 }
 0x3bc   :  { %v1766_v49 = vpop.f32.mrb[5].mxu0  ;;  %v709_v50 = vsel %vm139_vm2, %v705_v48, -inf }
 0x3bd   :  { %710 = vmax.xlane.f32.xlu0 %v709_v50 }
 0x44a   :  { %v711_v52 = vpop.xlane.xlu0 %710 }
 0x44b   :  { %v712_v56 = vsub.f32 %v705_v48, %v711_v52 }
 0x44d   :  { %v713_v59 = vmul.f32 1.442695, %v712_v56 }
 0x44f   :  { %1876 = vpow2.f32 %v713_v59 }
 0x459   :  { %v886_v54 = vpop.f32.mrb[6].mxu0  ;;  %v2178_v23 = vpop.eup %1876 }
 0x45a   :  { %v1776_v55 = vpop.f32.mrb[7].mxu0  ;;  %v890_v16 = vsel %vm139_vm2, %v886_v54, -inf  ;;  %v715_v25 = vsel %vm139_vm2, %v2178_v23, 0.0 }
 0x45e   :  { %v1051_v58 = vpop.f32.mrb[8].mxu0 }
 0x45f   :  { %v2169_v60 = vpop.f32.mrb[2].mxu1  ;;  %v1786_v61 = vpop.f32.mrb[9].mxu0  ;;  %v1055_v62 = vsel %vm139_vm2, %v1051_v58, -inf }
 0x460   :  { %1056 = vmax.xlane.f32.xlu0 %v1055_v62  ;;  %v1741_v63 = vpop.f32.mrb[3].mxu1 }
 0x463   :  { %v375_v4 = vpop.f32.mrb[4].mxu1 }
 0x464   :  { %v1746_v7 = vpop.f32.mrb[5].mxu1  ;;  %v379_v10 = vsel %vm139_vm2, %v375_v4, -inf }
 0x465   :  { %v1216_v12 = vpop.f32.mrb[10].mxu0  ;;  %380 = vmax.xlane.f32.xlu1 %v379_v10 }
 0x466   :  { %v1796_v15 = vpop.f32.mrb[11].mxu0  ;;  %v1220_v22 = vsel %vm139_vm2, %v1216_v12, -inf }
 0x469   :  { %v1381_v18 = vpop.f32.mrb[12].mxu0  ;;  %891 = vmax.xlane.f32.xlu1 %v890_v16 }
 0x46a   :  { %v1806_v19 = vpop.f32.mrb[13].mxu0  ;;  %v1385_v20 = vsel %vm139_vm2, %v1381_v18, -inf }
 0x46b   :  { %1386 = vmax.xlane.f32.xlu0 %v1385_v20 }
 0x46d   :  { %1221 = vmax.xlane.f32.xlu1 %v1220_v22 }
 0x46f   :  { %551 = vadd.xlane.f32.xlu0 %v550_v24  ;;  %v1865_v24 = vpack.i.bf16 %v2059_v5, %v2053_v2 }
 0x471   :  { %716 = vadd.xlane.f32.xlu1 %v715_v25 }
 0x4ed   :  { %v1057_v26 = vpop.xlane.xlu0 %1056 }
 0x4ee   :  { %v1058_v27 = vsub.f32 %v1051_v58, %v1057_v26 }
 0x4f0   :  { %v1059_v28 = vmul.f32 1.442695, %v1058_v27 }
 0x4f2   :  { %1878 = vpow2.f32 %v1059_v28  ;;  %v381_v30 = vpop.xlane.xlu1 %380 }
 0x4f3   :  { %v382_v48 = vsub.f32 %v375_v4, %v381_v30 }
 0x4f5   :  { %v383_v49 = vmul.f32 1.442695, %v382_v48 }
 0x4f6   :  { %v892_v31 = vpop.xlane.xlu1 %891 }
 0x4f7   :  { %v893_v32 = vsub.f32 %v886_v54, %v892_v31 }
 0x4f8   :  { %v1387_v33 = vpop.xlane.xlu0 %1386 }
 0x4f9   :  { %v894_v34 = vmul.f32 1.442695, %v893_v32  ;;  %v1388_v35 = vsub.f32 %v1381_v18, %v1387_v33 }
 0x4fa   :  { %v1222_v36 = vpop.xlane.xlu1 %1221 }
 0x4fb   :  { %1880 = vpow2.f32 %v894_v34  ;;  %v1389_v37 = vmul.f32 1.442695, %v1388_v35  ;;  %v1223_v38 = vsub.f32 %v1216_v12, %v1222_v36 }
 0x4fc   :  { %v2184_v39 = vpop.eup %1878  ;;  %v552_v52 = vpop.xlane.xlu0 %551 }
 0x4fd   :  { %1882 = vpow2.f32 %v1389_v37  ;;  %v1224_v40 = vmul.f32 1.442695, %v1223_v38  ;;  %v1061_v41 = vsel %vm139_vm2, %v2184_v39, 0.0 }
 0x4fe   :  { %1062 = vadd.xlane.f32.xlu1 %v1061_v41  ;;  %v717_v56 = vpop.xlane.xlu1 %716 }
 0x4ff   :  { %1884 = vpow2.f32 %v1224_v40 }
 0x500   :  { %1886 = vpow2.f32 %v383_v49 }
 0x505   :  { %v2188_v42 = vpop.eup %1880 }
 0x506   :  { %v896_v43 = vsel %vm139_vm2, %v2188_v42, 0.0 }
 0x507   :  { %v2192_v44 = vpop.eup %1882  ;;  %897 = vadd.xlane.f32.xlu0 %v896_v43 }
 0x508   :  { %v1391_v45 = vsel %vm139_vm2, %v2192_v44, 0.0 }
 0x509   :  { %v2196_v46 = vpop.eup %1884  ;;  %1392 = vadd.xlane.f32.xlu1 %v1391_v45 }
 0x50a   :  { %v1226_v47 = vsel %vm139_vm2, %v2196_v46, 0.0  ;;  %v1887_v50 = vpop.eup %1886 }
 0x50b   :  { %1227 = vadd.xlane.f32.xlu0 %v1226_v47  ;;  %v385_v51 = vsel %vm139_vm2, %v1887_v50, 0.0 }
 0x51a   :  { %555 = vrot.lane.b32.xlu1 %v2089_v17, %s1992_s18 }
 0x521   :  { %390 = vrot.lane.b32.xlu0 %v2089_v17, %s1993_s19 }
 0x525   :  { %901 = vrot.lane.b32.xlu0 %v2120_v29, %s1984_s11 }
 0x529   :  { %1231 = vrot.lane.b32.xlu0 %v2120_v29, %s1992_s18 }
 0x52d   :  { %1861 = vrot.lane.b32.xlu0 %v1860_v3, %s1995_s21 }
 0x53e   :  { %386 = vadd.xlane.f32.xlu1 %v385_v51 }
 0x54f   :  { %720 = vrot.lane.b32.xlu1 %v2089_v17, %s1994_s20 }
 0x553   :  { %1066 = vrot.lane.b32.xlu1 %v2120_v29, %s1993_s19 }
 0x557   :  { %1396 = vrot.lane.b32.xlu1 %v2120_v29, %s1994_s20 }
 0x55b   :  { %1866 = vrot.lane.b32.xlu1 %v1865_v24, %s1995_s21 }
 0x58b   :  { %v1063_v57 = vpop.xlane.xlu1 %1062 }
 0x594   :  { %v898_v53 = vpop.xlane.xlu0 %897 }
 0x596   :  { %v1393_v17 = vpop.xlane.xlu1 %1392 }
 0x598   :  { %v1228_v54 = vpop.xlane.xlu0 %1227 }
 0x59a   :  { %v556_v58 = vpop.permute.xlu1 %555 }
 0x59c   :  { %v391_v55 = vpop.permute.xlu0 %390 }
 0x59d   :  { %1748 = vmatpush3.msra.mxu1 %v391_v55 }
 0x59e   :  { %1757 = vmatprep.subr.mxu1 %v1982_v9 }
 0x5a0   :  { %v902_v7 = vpop.permute.xlu0 %901 }
 0x5a4   :  { %v1232_v19 = vpop.permute.xlu0 %1231 }
 0x5a8   :  { %v1862_v25 = vpop.permute.xlu0 %1861 }
 0x5a9   :  { %v1864_v26 = vunpack.i.h.bf16 %v1862_v25  ;;  %v1863_v27 = vunpack.i.l.bf16 %v1862_v25 }
 0x5ab   :  { %v1831_v28 = vpack.c.bf16 %v1864_v26, %v1863_v27 }
 0x5ad   :  { %1832 = vmatprep.subr.bf16.mxu0 %v1831_v28 }
 0x5ae   :  { %1834 = vmatpush3.bf16.msra.mxu0 %v1831_v28 }
 0x5cb   :  { %v387_v59 = vpop.xlane.xlu1 %386 }
 0x5cc   :  { %1888 = vrcp.f32 %v387_v59 }
 0x5cd   :  { %1890 = vrcp.f32 %v552_v52 }
 0x5ce   :  { %1892 = vrcp.f32 %v717_v56 }
 0x5cf   :  { %1894 = vrcp.f32 %v898_v53  ;;  %v721_v62 = vpop.permute.xlu1 %720 }
 0x5d0   :  { %1896 = vrcp.f32 %v1063_v57 }
 0x5d1   :  { %1898 = vrcp.f32 %v1228_v54 }
 0x5d2   :  { %1900 = vrcp.f32 %v1393_v17 }
 0x5d3   :  { %v1067_v15 = vpop.permute.xlu1 %1066 }
 0x5d6   :  { %v1889_v29 = vpop.eup %1888 }
 0x5d7   :  { %v389_v61 = vmul.f32 %v1889_v29, %v1887_v50  ;;  %v1891_v0 = vpop.eup %1890  ;;  %v1397_v22 = vpop.permute.xlu1 %1396 }
 0x5d8   :  { %v554_v1 = vmul.f32 %v1891_v0, %v2175_v21  ;;  %v1893_v3 = vpop.eup %1892 }
 0x5d9   :  { %1750 = vmatmul.mubr.msk.f32.vlgmr.msra.gmra.mrb[6].mxu1 %vm139_vm2, %v389_v61  ;;  %v719_v63 = vmul.f32 %v1893_v3, %v2178_v23  ;;  %v1895_v4 = vpop.eup %1894 }
 0x5da   :  { %1758 = vmatpush3.msra.mxu1 %v556_v58  ;;  %1759 = vmatprep.mubr.msk.f32.mxu1 %vm1983_vm1, %v1982_v9  ;;  %v900_v10 = vmul.f32 %v1895_v4, %v2188_v42  ;;  %v1897_v12 = vpop.eup %1896 }
 0x5db   :  { %1767 = vmatprep.subr.mxu1 %v1982_v9  ;;  %v1065_v16 = vmul.f32 %v1897_v12, %v2184_v39  ;;  %v1899_v18 = vpop.eup %1898  ;;  %v1867_v30 = vpop.permute.xlu1 %1866 }
 0x5dc   :  { %v1230_v20 = vmul.f32 %v1899_v18, %v2196_v46  ;;  %v1901_v21 = vpop.eup %1900  ;;  %v1869_v31 = vunpack.i.h.bf16 %v1867_v30  ;;  %v1868_v32 = vunpack.i.l.bf16 %v1867_v30 }
 0x5dd   :  { %1760 = vmatmul.mubr.msk.f32.vlgmr.msra.gmra.mrb[8].mxu1 %vm139_vm2, %v554_v1  ;;  %v1395_v23 = vmul.f32 %v1901_v21, %v2192_v44 }
 0x5de   :  { %1768 = vmatpush3.msra.mxu1 %v721_v62  ;;  %1769 = vmatprep.mubr.msk.f32.mxu1 %vm1983_vm1, %v1982_v9  ;;  %v1835_v33 = vpack.c.bf16 %v1869_v31, %v1868_v32 }
 0x5df   :  { %1777 = vmatprep.subr.mxu1 %v1982_v9 }
 0x5e0   :  { %1836 = vmatprep.subr.bf16.mxu0 %v1835_v33 }
 0x5e1   :  { %1770 = vmatmul.mubr.msk.f32.vlgmr.msra.gmra.mrb[10].mxu1 %vm139_vm2, %v719_v63  ;;  %1838 = vmatpush3.bf16.msra.mxu0 %v1835_v33 }
 0x5e2   :  { %1778 = vmatpush3.msra.mxu1 %v902_v7  ;;  %1779 = vmatprep.mubr.msk.f32.mxu1 %vm1983_vm1, %v1982_v9 }
 0x5e3   :  { %1787 = vmatprep.subr.mxu1 %v1982_v9 }
 0x5e5   :  { %1780 = vmatmul.mubr.msk.f32.vlgmr.msra.gmra.mrb[12].mxu1 %vm139_vm2, %v900_v10 }
 0x5e6   :  { %1788 = vmatpush3.msra.mxu1 %v1067_v15  ;;  %1789 = vmatprep.mubr.msk.f32.mxu1 %vm1983_vm1, %v1982_v9 }
 0x5e7   :  { %1797 = vmatprep.subr.mxu1 %v1982_v9 }
 0x5e9   :  { %1790 = vmatmul.mubr.msk.f32.vlgmr.msra.gmra.mrb[14].mxu1 %vm139_vm2, %v1065_v16 }
 0x5ea   :  { %1798 = vmatpush3.msra.mxu1 %v1232_v19  ;;  %1799 = vmatprep.mubr.msk.f32.mxu1 %vm1983_vm1, %v1982_v9 }
 0x5eb   :  { %1807 = vmatprep.subr.mxu1 %v1982_v9 }
 0x5ed   :  { %1800 = vmatmul.mubr.msk.f32.vlgmr.msra.gmra.mrb[16].mxu1 %vm139_vm2, %v1230_v20 }
 0x5ee   :  { %1808 = vmatpush3.msra.mxu1 %v1397_v22  ;;  %1809 = vmatprep.mubr.msk.f32.mxu1 %vm1983_vm1, %v1982_v9 }
 0x5f1   :  { %1810 = vmatmul.mubr.msk.f32.vlgmr.msra.gmra.mrb[18].mxu1 %vm139_vm2, %v1395_v23 }
 0x6ac   :  { %v462_v9 = vpop.f32.mrb[6].mxu1 }
 0x6ad   :  { %797 = vrot.lane.b32.xlu0 %v462_v9, %s1980_s23  ;;  %v1751_v34 = vpop.f32.mrb[7].mxu1 }
 0x6b0   :  { %v627_v35 = vpop.f32.mrb[8].mxu1 }
 0x6b1   :  { %801 = vrot.lane.b32.xlu1 %v627_v35, %s1996_s24  ;;  %v1761_v2 = vpop.f32.mrb[9].mxu1 }
 0x6b4   :  { %v792_v5 = vpop.f32.mrb[10].mxu1 }
 0x6b5   :  { %805 = vrot.lane.b32.xlu1 %v792_v5, %s1997_s25  ;;  %v1771_v36 = vpop.f32.mrb[11].mxu1 }
 0x6b8   :  { %v973_v37 = vpop.f32.mrb[12].mxu1 }
 0x6b9   :  { %v1781_v38 = vpop.f32.mrb[13].mxu1 }
 0x6bc   :  { %v1138_v39 = vpop.f32.mrb[14].mxu1 }
 0x6bd   :  { %1473 = vrot.lane.b32.xlu0 %v1138_v39, %s1980_s23  ;;  %v1791_v40 = vpop.f32.mrb[15].mxu1 }
 0x6c0   :  { %v1303_v41 = vpop.f32.mrb[16].mxu1 }
 0x6c1   :  { %1477 = vrot.lane.b32.xlu0 %v1303_v41, %s1996_s24  ;;  %v1801_v42 = vpop.f32.mrb[17].mxu1 }
 0x6c4   :  { %v1468_v43 = vpop.f32.mrb[18].mxu1 }
 0x6c5   :  { %1481 = vrot.lane.b32.xlu1 %v1468_v43, %s1997_s25  ;;  %v1811_v44 = vpop.f32.mrb[19].mxu1  ;;  %1504 = vrot.lane.b32.xlu0 %v2086_v14, %s1995_s21 }
 0x71f   :  { %v798_v45 = vpop.permute.xlu0 %797 }
 0x720   :  { %v808_v47 = vsel %vm139_vm2, %v2169_v60, %v798_v45 }
 0x723   :  { %v802_v46 = vpop.permute.xlu1 %801 }
 0x724   :  { %v810_v48 = vsel %vm809_vm3, %v808_v47, %v802_v46 }
 0x727   :  { %v806_v49 = vpop.permute.xlu1 %805 }
 0x728   :  { %v812_v50 = vsel %vm811_vm4, %v810_v48, %v806_v49 }
 0x729   :  { %1820 = vmatprep.mubr.msk.f32.mxu0 %vm54_vm0, %v812_v50 }
 0x72f   :  { %v1474_v51 = vpop.permute.xlu0 %1473 }
 0x730   :  { %v1484_v53 = vsel %vm139_vm2, %v973_v37, %v1474_v51 }
 0x733   :  { %v1478_v52 = vpop.permute.xlu0 %1477 }
 0x734   :  { %v1485_v54 = vsel %vm809_vm3, %v1484_v53, %v1478_v52 }
 0x737   :  { %v1482_v55 = vpop.permute.xlu1 %1481  ;;  %v1505_v14 = vpop.permute.xlu0 %1504 }
 0x738   :  { %v1486_v56 = vsel %vm811_vm4, %v1485_v54, %v1482_v55 }
 0x739   :  { %1821 = vmatmul.mubr.msk.f32.vlgmr.msra.gmra.mrb[14].mxu0 %vm54_vm0, %v1486_v56 }
 0x80c   :  { %v1822_v57 = vpop.f32.mrb[14].mxu0 }
 0x80d   :  { %v1585_v17 = vadd.f32 %v1822_v57, %v1505_v14  ;;  %v1579_v58 = vpop.f32.mrb[15].mxu0 }
 0x80e   :  { %v1580_v59 = vadd.f32 %v1579_v58, %v1505_v14 }
 0x80f   :  { %v1589_v60 = vadd.f32 %v1585_v17, %v2067_v8 }
 0x810   :  { %v1588_v29 = vadd.f32 %v1580_v59, %v2061_v6  ;;  %v1619_v6 = vsub.s32 1, %v2073_v11 }
 0x811   :  { %v1593_v61 = vsel %vm54_vm0, %v1589_v60, 0.0 }
 0x812   :  { %1594 = vadd.xlane.f32.xlu0 %v1593_v61  ;;  %v1590_v0 = vsel %vm54_vm0, %v1588_v29, 0.0  ;;  %v1620_v16 = vrot.slane %v2083_v13, %v1619_v6 }
 0x813   :  { %1591 = vadd.xlane.f32.xlu1 %v1590_v0 }
 0x89f   :  { %v1595_v1 = vpop.xlane.xlu0 %1594 }
 0x8a0   :  { %v1598_v3 = vmul.f32 0.03125, %v1595_v1  ;;  %v1592_v62 = vpop.xlane.xlu1 %1591 }
 0x8a1   :  { %v1597_v63 = vmul.f32 0.03125, %v1592_v62 }
 0x8a2   :  { %v1600_v4 = vsub.f32 %v1589_v60, %v1598_v3 }
 0x8a3   :  { %v1599_v7 = vsub.f32 %v1588_v29, %v1597_v63 }
 0x8a4   :  { %v1602_v10 = vmul.f32 %v1600_v4, %v1600_v4 }
 0x8a5   :  { %v1601_v12 = vmul.f32 %v1599_v7, %v1599_v7 }
 0x8a6   :  { %v1606_v15 = vsel %vm54_vm0, %v1602_v10, 0.0 }
 0x8a7   :  { %1607 = vadd.xlane.f32.xlu1 %v1606_v15  ;;  %v1603_v8 = vsel %vm54_vm0, %v1601_v12, 0.0 }
 0x8a8   :  { %1604 = vadd.xlane.f32.xlu0 %v1603_v8 }
 0x8be   :  { %1624 = vrot.lane.b32.xlu0 %v1620_v16, %s1985_s12 }
 0x934   :  { %v1608_v18 = vpop.xlane.xlu1 %1607 }
 0x935   :  { %v1610_v19 = vmul.f32 0.03125, %v1608_v18  ;;  %v1605_v20 = vpop.xlane.xlu0 %1604 }
 0x936   :  { %v1609_v21 = vmul.f32 0.03125, %v1605_v20 }
 0x937   :  { %v1612_v22 = vadd.f32 1e-12, %v1610_v19 }
 0x938   :  { %v1611_v23 = vadd.f32 1e-12, %v1609_v21 }
 0x939   :  { %1902 = vrsqrt.f32 %v1612_v22  ;;  %v1625_v28 = vpop.permute.xlu0 %1624 }
 0x93a   :  { %1904 = vrsqrt.f32 %v1611_v23 }
 0x943   :  { %v1903_v24 = vpop.eup %1902 }
 0x944   :  { %v1905_v25 = vpop.eup %1904  ;;  %v1616_v26 = vmul.f32 %v1903_v24, %v1600_v4 }
 0x945   :  { %v1615_v27 = vmul.f32 %v1905_v25, %v1599_v7 }
 0x946   :  { %v1622_v30 = vmul.f32 %v1620_v16, %v1616_v26 }
 0x947   :  { %v1621_v11 = vmul.f32 %v1620_v16, %v1615_v27 }
 0x948   :  { %v1628_v13 = vadd.f32 %v1625_v28, %v1622_v30 }
 0x949   :  { %v1627_v31 = vadd.f32 %v1625_v28, %v1621_v11 }
 0x94a   :  { %1630 = vst.msk [vmem:[#allocation7 + $0x8] sm:$0xff] %vm54_vm0, %v1628_v13 }
 0x94b   :  { %1629 = vst.msk [vmem:[#allocation7] sm:$0xff] %vm54_vm0, %v1627_v31 }
 0x94c   :  { %1961 = shalt.err (!%p1958_p6)
}
 0x94d   :  { %s1962_s4 = scalar_lea.hbm %s2285_s3, 256 }
 0x94e   :  { %p1963_p7 = scmp.ne.s32.totalorder %s2285_s3, %s1962_s4  ;;  %p1966_p8 = scmp.lt.u32.totalorder %s1962_s4, %s2285_s3 }
 0x950   :  { %p1968_p9 = pnand %p1966_p8, %p1963_p7 }
 0x952   :  { %1971 = shalt.err (!%p1968_p9)
}
 0x953   :  { %1642 = dma.vmem_to_hbm [thread:$0]  %s1637_s27, 256, %s2285_s3, [#allocation4], %s1979_s22, %s1979_s22, %s1980_s23  }
 0x954   :  { %1976 = dma.done.wait [#allocation4], 256  }
 0x955   :  { %1977 = vsyncadd [#allocation4], 4294967040 }
 0x956   :  { %1646 = vsyncpa [#allocation3], 1 }
 0x957   :  { %1647 = vsyncpa [#allocation6], 1 }
 0x958   :  { %1648 = vsyncpa [#allocation4], 1 }

</bundles_post_ra>
